<compile_context>
chip_gen: v6e
topology: v6e:2x2x1
jax: 0.10.0
libtpu: 0.0.40
codegen_flags: <defaults>
</compile_context>

<pallas_src>
import jax
import jax.numpy as jnp
from jax.experimental import pallas as pl
from jax.experimental.pallas import tpu as pltpu


def _additive_attention_kernel(q_ref, k_ref, v_ref, wq_ref, wk_ref, b_ref,
                               ws_ref, bs_ref, ctx_ref, attn_ref):
    tb, L, H = v_ref.shape

    q = q_ref[0]            # (tb, H)        all queries in this batch tile
    k = k_ref[0]            # (tb*L, H)      keys with batch*length folded to sublanes
    v = v_ref[...]          # (tb, L, H)
    wq_t = wq_ref[...]      # (H, H) == Wq^T
    wk_t = wk_ref[...]      # (H, H) == Wk^T
    bias = b_ref[...]       # (1, 1, H)
    ws = ws_ref[...]        # (1, 1, H)      score_proj weight row
    bs = bs_ref[...]        # (1, 1)         score_proj bias

    # Batched projections on the MXU: one big key matmul + one batched query matmul.
    kp = jnp.dot(k, wk_t, preferred_element_type=jnp.float32)      # (tb*L, H)
    qp = jnp.dot(q, wq_t, preferred_element_type=jnp.float32)      # (tb, H)

    # tanh(K + Q + b); reshape only splits the sublane-major axis (L == 8 aligned).
    p = jnp.tanh(kp.reshape(tb, L, H) + qp[:, None, :] + bias)     # (tb, L, H)

    # Additive score, lane-major: reduce H (lane axis) -> (tb, L) with L in lanes.
    score = jnp.sum(p * ws, axis=-1) + bs                          # (tb, L)

    # Softmax along lanes (last axis).
    m = jnp.max(score, axis=-1, keepdims=True)                     # (tb, 1)
    e = jnp.exp(score - m)                                         # (tb, L)
    d = jnp.sum(e, axis=-1, keepdims=True)                         # (tb, 1)
    r = pl.reciprocal(d, approx=True)                              # EUP vrcp
    r = r * (2.0 - d * r)                                          # 1 Newton step -> ~f32 exact
    attn = e * r                                                   # (tb, L)

    # Context via MXU contraction over L: (tb,1,L) x (tb,L,H) -> (tb,1,H).
    ctx = jnp.einsum('bql,blh->bqh', attn[:, None, :], v,
                     preferred_element_type=jnp.float32)           # (tb, 1, H)

    ctx_ref[...] = ctx.astype(ctx_ref.dtype)
    attn_ref[...] = attn[None].astype(attn_ref.dtype)              # (1, tb, L), no relayout


def _batch_tiling(B, L, H, itemsize=4):
    """Pick the batch tile TB and number of grid steps."""
    # Conservative per-tile VMEM budget (double-buffered) -> fine even for v7x (64 MiB).
    per_batch_bytes = (2 * L * H + 2 * H + L) * itemsize
    max_tb = max(1, (8 * 1024 * 1024) // max(per_batch_bytes, 1))
    tb = min(B, max_tb)
    num_steps = pl.cdiv(B, tb)
    if B >= 2 and num_steps < 2:
        # Keep >= 2 parallel grid steps so both v7x TensorCores get work.
        num_steps = 2
        tb = pl.cdiv(B, num_steps)
    return tb, num_steps


def additive_attention(query, key, value, wq_t, wk_t, bias, ws, bs):
    """query: (B,1,H), key/value: (B,L,H), wq_t/wk_t: (H,H) pre-transposed,
    bias: (H,), ws: (1,H), bs: (1,). Returns (context (B,1,H), attn (B,L))."""
    B, Lq, H = query.shape
    _, L, _ = key.shape
    assert Lq == 1, "canonical Bahdanau usage: q_len == 1"

    tb, num_steps = _batch_tiling(B, L, H)
    B_pad = tb * num_steps
    if B_pad != B:
        pad = B_pad - B
        query = jnp.pad(query, ((0, pad), (0, 0), (0, 0)))
        key = jnp.pad(key, ((0, pad), (0, 0), (0, 0)))
        value = jnp.pad(value, ((0, pad), (0, 0), (0, 0)))

    # Wrapper-side (free) reshapes: fold batch*length onto the sublane axis for keys,
    # present queries as (step, TB, H) so each grid step grabs one dense slab.
    q_in = query.reshape(num_steps, tb, H)
    k_in = key.reshape(num_steps, tb * L, H)
    v_in = value                                   # (B_pad, L, H)
    bias_in = bias.reshape(1, 1, H)
    ws_in = ws.reshape(1, 1, H)
    bs_in = bs.reshape(1, 1)

    grid_spec = pltpu.PrefetchScalarGridSpec(
        num_scalar_prefetch=0,
        grid=(num_steps,),
        in_specs=[
            pl.BlockSpec((1, tb, H), lambda i: (i, 0, 0)),       # query tile
            pl.BlockSpec((1, tb * L, H), lambda i: (i, 0, 0)),   # key tile (B*L on sublanes)
            pl.BlockSpec((tb, L, H), lambda i: (i, 0, 0)),       # value tile
            # Grid-invariant weights: constant index_map -> not re-DMA'd per step.
            pl.BlockSpec((H, H), lambda i: (0, 0)),              # Wq^T
            pl.BlockSpec((H, H), lambda i: (0, 0)),              # Wk^T
            pl.BlockSpec((1, 1, H), lambda i: (0, 0, 0)),        # bias
            pl.BlockSpec((1, 1, H), lambda i: (0, 0, 0)),        # score weight
            pl.BlockSpec((1, 1), lambda i: (0, 0)),              # score bias
        ],
        out_specs=[
            pl.BlockSpec((tb, 1, H), lambda i: (i, 0, 0)),       # context
            pl.BlockSpec((1, tb, L), lambda i: (i, 0, 0)),       # attn (lane-major L)
        ],
    )

    ctx, attn = pl.pallas_call(
        _additive_attention_kernel,
        out_shape=(
            jax.ShapeDtypeStruct((B_pad, 1, H), jnp.float32),
            jax.ShapeDtypeStruct((num_steps, tb, L), jnp.float32),
        ),
        grid_spec=grid_spec,
        compiler_params=pltpu.CompilerParams(
            dimension_semantics=("parallel",)),
    )(q_in, k_in, v_in, wq_t, wk_t, bias_in, ws_in, bs_in)

    context = ctx[:B]
    attn = attn.reshape(B_pad, L)[:B]
    return context, attn


def reference_forward(query, key, value, wq_t, wk_t, bias, ws, bs):
    k = key @ wk_t
    q = query @ wq_t
    p = jnp.tanh(k + q + bias)
    score = jnp.squeeze(p @ ws.reshape(-1, 1), -1) + bs[0]
    attn = jax.nn.softmax(score, axis=-1)
    context = jnp.einsum("bl,blh->bh", attn, value)[:, None, :]
    return context, attn


def _check(B, L, H, seed=0):
    key0 = jax.random.PRNGKey(seed)
    k_q, k_k, k_v, k_wq, k_wk, k_b, k_ws, k_bs = jax.random.split(key0, 8)

    query = jax.random.normal(k_q, (B, 1, H), dtype=jnp.float32)
    keys = jax.random.normal(k_k, (B, L, H), dtype=jnp.float32)
    value = jax.random.normal(k_v, (B, L, H), dtype=jnp.float32)

    # Deterministic parameter init (shapes match nn.Linear / nn.Parameter).
    lim = 1.0 / jnp.sqrt(H)
    wq = jax.random.uniform(k_wq, (H, H), minval=-lim, maxval=lim, dtype=jnp.float32)
    wk = jax.random.uniform(k_wk, (H, H), minval=-lim, maxval=lim, dtype=jnp.float32)
    bias = jax.random.uniform(k_b, (H,), minval=-0.1, maxval=0.1, dtype=jnp.float32)
    ws = jax.random.uniform(k_ws, (1, H), minval=-lim, maxval=lim, dtype=jnp.float32)
    bs = jax.random.uniform(k_bs, (1,), minval=-lim, maxval=lim, dtype=jnp.float32)

    # nn.Linear computes x @ W^T -> pass weights pre-transposed.
    wq_t = wq.T
    wk_t = wk.T

    context, attn = additive_attention(query, keys, value, wq_t, wk_t, bias, ws, bs)
    context = jax.block_until_ready(context)
    attn = jax.block_until_ready(attn)

    ctx_ref, attn_ref = reference_forward(query, keys, value, wq_t, wk_t, bias, ws, bs)
    assert context.shape == (B, 1, H) and attn.shape == (B, L)
    assert jnp.allclose(context, ctx_ref, rtol=1e-5, atol=1e-5)
    assert jnp.allclose(attn, attn_ref, rtol=1e-5, atol=1e-5)


if __name__ == "__main__":
    # Primary shape: B=4 exercises the batch-tiled grid (2 parallel steps x TB=2).
    _check(B=4, L=8, H=32)
    # Also exercise the small-batch path (TB=1, 2 steps).
    _check(B=2, L=8, H=32)
    print("KERNEL_OK")
</pallas_src>

<mosaic_0001>
module attributes {stable_mosaic.version = 11 : i64} {
  func.func @_additive_attention_kernel(%arg0: i32, %arg1: memref<1x2x32xf32, #tpu.memory_space<vmem>>, %arg2: memref<1x16x32xf32, #tpu.memory_space<vmem>>, %arg3: memref<2x8x32xf32, #tpu.memory_space<vmem>>, %arg4: memref<32x32xf32, #tpu.memory_space<vmem>>, %arg5: memref<32x32xf32, #tpu.memory_space<vmem>>, %arg6: memref<1x1x32xf32, #tpu.memory_space<vmem>>, %arg7: memref<1x1x32xf32, #tpu.memory_space<vmem>>, %arg8: memref<1x1xf32, #tpu.memory_space<vmem>>, %arg9: memref<2x1x32xf32, #tpu.memory_space<vmem>>, %arg10: memref<1x2x8xf32, #tpu.memory_space<vmem>>) attributes {dimension_semantics = [#tpu.dimension_semantics<parallel>], iteration_bounds = array<i64: 2>, scalar_prefetch = 0 : i64, scratch_operands = 0 : i64, tpu.core_type = #tpu.core_type<tc>, window_params = [{transform_indices = @transform_0, window_bounds = array<i64: 1, 2, 32>}, {transform_indices = @transform_1, window_bounds = array<i64: 1, 16, 32>}, {transform_indices = @transform_2, window_bounds = array<i64: 2, 8, 32>}, {pipeline_mode = #tpu.pipeline_mode<synchronous>, transform_indices = @transform_3, window_bounds = array<i64: 32, 32>}, {pipeline_mode = #tpu.pipeline_mode<synchronous>, transform_indices = @transform_4, window_bounds = array<i64: 32, 32>}, {pipeline_mode = #tpu.pipeline_mode<synchronous>, transform_indices = @transform_5, window_bounds = array<i64: 1, 1, 32>}, {pipeline_mode = #tpu.pipeline_mode<synchronous>, transform_indices = @transform_6, window_bounds = array<i64: 1, 1, 32>}, {pipeline_mode = #tpu.pipeline_mode<synchronous>, transform_indices = @transform_7, window_bounds = array<i64: 1, 1>}, {transform_indices = @transform_8, window_bounds = array<i64: 2, 1, 32>}, {transform_indices = @transform_9, window_bounds = array<i64: 1, 2, 8>}]} {
    %c0 = arith.constant 0 : index
    %c0_0 = arith.constant 0 : index
    %c0_1 = arith.constant 0 : index
    %0 = vector.load %arg1[%c0, %c0_0, %c0_1] : memref<1x2x32xf32, #tpu.memory_space<vmem>>, vector<1x2x32xf32>
    %1 = vector.shape_cast %0 : vector<1x2x32xf32> to vector<2x32xf32>
    %c0_2 = arith.constant 0 : index
    %c0_3 = arith.constant 0 : index
    %c0_4 = arith.constant 0 : index
    %2 = vector.load %arg2[%c0_2, %c0_3, %c0_4] : memref<1x16x32xf32, #tpu.memory_space<vmem>>, vector<1x16x32xf32>
    %3 = vector.shape_cast %2 : vector<1x16x32xf32> to vector<16x32xf32>
    %c0_5 = arith.constant 0 : index
    %c0_6 = arith.constant 0 : index
    %c0_7 = arith.constant 0 : index
    %4 = vector.load %arg3[%c0_5, %c0_6, %c0_7] : memref<2x8x32xf32, #tpu.memory_space<vmem>>, vector<2x8x32xf32>
    %c0_8 = arith.constant 0 : index
    %c0_9 = arith.constant 0 : index
    %5 = vector.load %arg4[%c0_8, %c0_9] : memref<32x32xf32, #tpu.memory_space<vmem>>, vector<32x32xf32>
    %c0_10 = arith.constant 0 : index
    %c0_11 = arith.constant 0 : index
    %6 = vector.load %arg5[%c0_10, %c0_11] : memref<32x32xf32, #tpu.memory_space<vmem>>, vector<32x32xf32>
    %c0_12 = arith.constant 0 : index
    %c0_13 = arith.constant 0 : index
    %c0_14 = arith.constant 0 : index
    %7 = vector.load %arg6[%c0_12, %c0_13, %c0_14] : memref<1x1x32xf32, #tpu.memory_space<vmem>>, vector<1x1x32xf32>
    %c0_15 = arith.constant 0 : index
    %c0_16 = arith.constant 0 : index
    %c0_17 = arith.constant 0 : index
    %8 = vector.load %arg7[%c0_15, %c0_16, %c0_17] : memref<1x1x32xf32, #tpu.memory_space<vmem>>, vector<1x1x32xf32>
    %c0_18 = arith.constant 0 : index
    %c0_19 = arith.constant 0 : index
    %9 = vector.load %arg8[%c0_18, %c0_19] : memref<1x1xf32, #tpu.memory_space<vmem>>, vector<1x1xf32>
    %cst = arith.constant dense<0.000000e+00> : vector<16x32xf32>
    %10 = tpu.matmul %3, %6, %cst {dimension_numbers = #tpu.dot_dimension_numbers<[1], [0], [0], [1], [0, 0, 1, 1], [], []>} : vector<16x32xf32>, vector<32x32xf32>, vector<16x32xf32> -> vector<16x32xf32>
    %cst_20 = arith.constant dense<0.000000e+00> : vector<2x32xf32>
    %11 = tpu.matmul %1, %5, %cst_20 {dimension_numbers = #tpu.dot_dimension_numbers<[1], [0], [0], [1], [0, 0, 1, 1], [], []>} : vector<2x32xf32>, vector<32x32xf32>, vector<2x32xf32> -> vector<2x32xf32>
    %12 = vector.shape_cast %10 : vector<16x32xf32> to vector<2x8x32xf32>
    %13 = vector.shape_cast %11 : vector<2x32xf32> to vector<2x1x32xf32>
    %14 = vector.broadcast %13 : vector<2x1x32xf32> to vector<2x8x32xf32>
    %15 = arith.addf %12, %14 : vector<2x8x32xf32>
    %16 = vector.broadcast %7 : vector<1x1x32xf32> to vector<2x8x32xf32>
    %17 = arith.addf %15, %16 : vector<2x8x32xf32>
    %18 = math.tanh %17 : vector<2x8x32xf32>
    %19 = vector.broadcast %8 : vector<1x1x32xf32> to vector<2x8x32xf32>
    %20 = arith.mulf %18, %19 : vector<2x8x32xf32>
    %cst_21 = arith.constant dense<0.000000e+00> : vector<2x8xf32>
    %21 = vector.multi_reduction <add>, %20, %cst_21 [2] : vector<2x8x32xf32> to vector<2x8xf32>
    %22 = vector.broadcast %9 : vector<1x1xf32> to vector<2x8xf32>
    %23 = arith.addf %21, %22 : vector<2x8xf32>
    %cst_22 = arith.constant dense<0xFF800000> : vector<2xf32>
    %24 = vector.multi_reduction <maximumf>, %23, %cst_22 [1] : vector<2x8xf32> to vector<2xf32>
    %25 = vector.shape_cast %24 : vector<2xf32> to vector<2x1xf32>
    %26 = vector.broadcast %25 : vector<2x1xf32> to vector<2x8xf32>
    %27 = arith.subf %23, %26 : vector<2x8xf32>
    %28 = math.exp %27 : vector<2x8xf32>
    %cst_23 = arith.constant dense<0.000000e+00> : vector<2xf32>
    %29 = vector.multi_reduction <add>, %28, %cst_23 [1] : vector<2x8xf32> to vector<2xf32>
    %30 = vector.shape_cast %29 : vector<2xf32> to vector<2x1xf32>
    %31 = tpu.reciprocal %30 {approx = true} : vector<2x1xf32> -> vector<2x1xf32>
    %32 = arith.mulf %30, %31 : vector<2x1xf32>
    %cst_24 = arith.constant 2.000000e+00 : f32
    %33 = vector.broadcast %cst_24 : f32 to vector<2x1xf32>
    %34 = arith.subf %33, %32 : vector<2x1xf32>
    %35 = arith.mulf %31, %34 : vector<2x1xf32>
    %36 = vector.broadcast %35 : vector<2x1xf32> to vector<2x8xf32>
    %37 = arith.mulf %28, %36 : vector<2x8xf32>
    %38 = vector.shape_cast %37 : vector<2x8xf32> to vector<2x1x8xf32>
    "tpu.trace_start"() <{level = 10 : i32, message = "bql,blh->bqh"}> : () -> ()
    %cst_25 = arith.constant dense<0.000000e+00> : vector<2x1x32xf32>
    %39 = tpu.matmul %38, %4, %cst_25 {dimension_numbers = #tpu.dot_dimension_numbers<[2], [1], [1], [2], [0, 0, 0, 1, 1, 2], [0], [0]>} : vector<2x1x8xf32>, vector<2x8x32xf32>, vector<2x1x32xf32> -> vector<2x1x32xf32>
    "tpu.trace_stop"() : () -> ()
    %c0_26 = arith.constant 0 : index
    %c0_27 = arith.constant 0 : index
    %c0_28 = arith.constant 0 : index
    %40 = vector.load %arg9[%c0_26, %c0_27, %c0_28] : memref<2x1x32xf32, #tpu.memory_space<vmem>>, vector<2x1x32xf32>
    tpu.vector_store %arg9[%c0_26, %c0_27, %c0_28], %39 {strides = array<i32>} : memref<2x1x32xf32, #tpu.memory_space<vmem>>, vector<2x1x32xf32>,
    %41 = vector.shape_cast %37 : vector<2x8xf32> to vector<1x2x8xf32>
    %c0_29 = arith.constant 0 : index
    %c0_30 = arith.constant 0 : index
    %c0_31 = arith.constant 0 : index
    %42 = vector.load %arg10[%c0_29, %c0_30, %c0_31] : memref<1x2x8xf32, #tpu.memory_space<vmem>>, vector<1x2x8xf32>
    tpu.vector_store %arg10[%c0_29, %c0_30, %c0_31], %41 {strides = array<i32>} : memref<1x2x8xf32, #tpu.memory_space<vmem>>, vector<1x2x8xf32>,
    return
  }
  func.func @transform_0(%arg0: i32) -> (i32, i32, i32) {
    %c0_i32 = arith.constant 0 : i32
    %c0_i32_0 = arith.constant 0 : i32
    %c0_i32_1 = arith.constant 0 : i32
    return %arg0, %c0_i32, %c0_i32_0 : i32, i32, i32
  }
  func.func @transform_1(%arg0: i32) -> (i32, i32, i32) {
    %c0_i32 = arith.constant 0 : i32
    %c0_i32_0 = arith.constant 0 : i32
    %c0_i32_1 = arith.constant 0 : i32
    return %arg0, %c0_i32, %c0_i32_0 : i32, i32, i32
  }
  func.func @transform_2(%arg0: i32) -> (i32, i32, i32) {
    %c0_i32 = arith.constant 0 : i32
    %c0_i32_0 = arith.constant 0 : i32
    %c0_i32_1 = arith.constant 0 : i32
    return %arg0, %c0_i32, %c0_i32_0 : i32, i32, i32
  }
  func.func @transform_3(%arg0: i32) -> (i32, i32) {
    %c0_i32 = arith.constant 0 : i32
    %c0_i32_0 = arith.constant 0 : i32
    %c0_i32_1 = arith.constant 0 : i32
    return %c0_i32, %c0_i32_0 : i32, i32
  }
  func.func @transform_4(%arg0: i32) -> (i32, i32) {
    %c0_i32 = arith.constant 0 : i32
    %c0_i32_0 = arith.constant 0 : i32
    %c0_i32_1 = arith.constant 0 : i32
    return %c0_i32, %c0_i32_0 : i32, i32
  }
  func.func @transform_5(%arg0: i32) -> (i32, i32, i32) {
    %c0_i32 = arith.constant 0 : i32
    %c0_i32_0 = arith.constant 0 : i32
    %c0_i32_1 = arith.constant 0 : i32
    %c0_i32_2 = arith.constant 0 : i32
    return %c0_i32, %c0_i32_0, %c0_i32_1 : i32, i32, i32
  }
  func.func @transform_6(%arg0: i32) -> (i32, i32, i32) {
    %c0_i32 = arith.constant 0 : i32
    %c0_i32_0 = arith.constant 0 : i32
    %c0_i32_1 = arith.constant 0 : i32
    %c0_i32_2 = arith.constant 0 : i32
    return %c0_i32, %c0_i32_0, %c0_i32_1 : i32, i32, i32
  }
  func.func @transform_7(%arg0: i32) -> (i32, i32) {
    %c0_i32 = arith.constant 0 : i32
    %c0_i32_0 = arith.constant 0 : i32
    %c0_i32_1 = arith.constant 0 : i32
    return %c0_i32, %c0_i32_0 : i32, i32
  }
  func.func @transform_8(%arg0: i32) -> (i32, i32, i32) {
    %c0_i32 = arith.constant 0 : i32
    %c0_i32_0 = arith.constant 0 : i32
    %c0_i32_1 = arith.constant 0 : i32
    return %arg0, %c0_i32, %c0_i32_0 : i32, i32, i32
  }
  func.func @transform_9(%arg0: i32) -> (i32, i32, i32) {
    %c0_i32 = arith.constant 0 : i32
    %c0_i32_0 = arith.constant 0 : i32
    %c0_i32_1 = arith.constant 0 : i32
    return %arg0, %c0_i32, %c0_i32_0 : i32, i32, i32
  }
}

</mosaic_0001>

<bundles_post_ra>
// kernel: tpu_custom_call.1
= control target key start
LH: loop header
LB: loop body
LE: loop exit
PB: predicated region body
PF: predicated region fallthrough
CT: control target
= control target key end

     0   :  { %s1997_s0 = inlined_call_operand.hbm [shape: f32[2,2,32], index: 0, kind: input, shape index: {}]   ;;  %s1998_s1 = inlined_call_operand.hbm [shape: f32[2,16,32], index: 1, kind: input, shape index: {}]   ;;  %s1999_s2 = inlined_call_operand.hbm [shape: f32[4,8,32], index: 2, kind: input, shape index: {}]   ;;  %s2000_s3 = inlined_call_operand.hbm [shape: f32[32,32], index: 3, kind: input, shape index: {}]   ;;  %s2001_s4 = inlined_call_operand.hbm [shape: f32[32,32], index: 4, kind: input, shape index: {}]   ;;  %s2002_s5 = inlined_call_operand.vmem [shape: f32[1,1,32], index: 5, kind: input, shape index: {}]   ;;  %s2003_s6 = inlined_call_operand.vmem [shape: f32[1,1,32], index: 6, kind: input, shape index: {}]   ;;  %s2004_s7 = inlined_call_operand.<no memory space> [shape: f32[1,1], index: 7, kind: input, shape index: {}]   ;;  %s2005_s8 = inlined_call_operand.hbm [shape: f32[4,1,32], index: 8, kind: output, shape index: {0}]   ;;  %s2006_s9 = inlined_call_operand.hbm [shape: f32[2,2,8], index: 9, kind: output, shape index: {1}]  }
   0x1   :  { %2027 = sst [smem:[#allocation25_spill]] %s1998_s1  ;;  %v15_v0 = vstv %s2004_s7 }
   0x2   :  { %2028 = sst [smem:[#allocation26_spill]] %s2000_s3  ;;  %16 = vst [vmem:[#allocation2] sm:$0x1] %v15_v0 }
   0x3   :  { %2029 = sst [smem:[#allocation27_spill]] %s2001_s4 }
   0x4   :  { %2030 = sst [smem:[#allocation28_spill]] %s2005_s8 }
   0x5   :  { %2031 = sst [smem:[#allocation29_spill]] %s2006_s9 }
   0x6   :  { %17 = vsyncpa [#allocation4], 0 }
   0x7   :  { %19 = vsyncpa [#allocation4 + $0x1], 0 }
   0x8   :  { %20 = vsyncpa [#allocation7], 0 }
   0x9   :  { %22 = vsyncpa [#allocation7 + $0x1], 0 }
   0xa   :  { %23 = vsyncpa [#allocation10], 0 }
   0xb   :  { %24 = vsyncpa [#allocation5], 0 }
   0xc   :  { %26 = vsyncpa [#allocation5 + $0x1], 0 }
   0xd   :  { %27 = vsyncpa [#allocation14], 0 }
   0xe   :  { %29 = vsyncpa [#allocation14 + $0x1], 0  ;;  %s1646_s11 = smov 0   ;;  %s1648_s12 = smov 0  }
   0xf   :  { %s1650_s13 = smov 0   ;;  %s1652_s14 = smov 0  }
  0x10 LB: > { %2032 = sst [smem:[#allocation20_spill]] %s1564_s11  ;;  %s1667_s7 = sadd.s32 4294967295, %s1576_s14   ;;  %s1576_s14 = sphi %s1652_s14, %s2065_s14   ;;  %s1572_s13 = sphi %s1650_s13, %s2067_s13   ;;  %s1568_s12 = sphi %s1648_s12, %s2069_s12   ;;  %s1564_s11 = sphi %s1646_s11, %s2068_s11  }
  0x11   : > { %2033 = sst [smem:[#allocation21_spill]] %s1572_s13  ;;  %s1150_s15 = sadd.s32 4294967294, %s1576_s14  }
  0x12   : > { %s1671_s16 = sadd.s32 1, %s1576_s14   ;;  %s42_s17 = sadd.s32 1, %s1572_s13 }
  0x13   : > { %2034 = sst [smem:[#allocation22_spill]] %s1671_s16  ;;  %s39_s18 = ssub.s32 %s1576_s14, %s1671_s16 }
  0x14   : > { %p49_p0 = scmp.ne.s32.totalorder %s1572_s13, %s1568_s12  ;;  %p40_p1 = scmp.eq.s32.totalorder %s39_s18, 0 }
  0x15   : > { %p50_p2 = scmp.eq.s32.totalorder %s1576_s14, 0  ;;  %p55_p3 = scmp.ne.s32.totalorder %s1568_s12, %s1564_s11 }
  0x16   : > { %p2007_p4 = scmp.eq.s32.totalorder %s1667_s7, 0  ;;  %p236_p7 = scmp.eq.s32.totalorder %s1667_s7, 1 }
  0x17   : > { %s1683_s19 = scalar_select %p40_p1, %s1572_s13, %s42_s17  }
  0x18   : > { %p1685_p5 = por %p50_p2, %p49_p0  ;;  %p1691_p6 = por %p2007_p4, %p55_p3 }
  0x19   : > { %2035 = sst [smem:[#allocation23_spill]] %s1683_s19  ;;  %p242_p8 = scmp.eq.s32.totalorder %s1150_s15, 1 }
  0x1a   : > { %s2037_s21 = scalar_select %p1691_p6, 1, 0 }
  0x1b   : > { %p1151_p9 = scmp.ge.s32.totalorder %s1576_s14, 1  ;;  %p275_p10 = scmp.lt.s32.totalorder %s1576_s14, 3 }
  0x1c   : > { %p1698_p11 = por %p236_p7, %p49_p0  ;;  %p1702_p12 = por %p242_p8, %p55_p3 }
  0x1d   : > { %p1706_p13 = pnand %p1151_p9, %p275_p10  ;;  %s1578_s25 = smov [#allocation9]  }
  0x1e   : > { %s2038_s22 = scalar_select %p1698_p11, 1, 0 }
  0x1f   : > { %s2039_s23 = scalar_select %p1702_p12, 1, 0 }
  0x20   : > { %s2041_s24 = scalar_select %p1706_p13, 1, 0 }
  0x21   : > { %2040 = sst [smem:[#allocation24_spill]] %s2039_s23  ;;  %p1254_p1 = pneg %p1706_p13 }
  0x22   : > { %s287_s26 = sshll.u32 %s1578_s25, 4  ;;  %p1280_p3 = scmp.lt.s32.totalorder %s1576_s14, 2  ;;  %s288_s26 = int_to_ptr.vmem [resolvable:$true] %s287_s26 }
  0x23   : > { %p1714_p2 = pnand %p1254_p1, %p2007_p4  ;;  %s1721_s28 = sand.u32 1, %s1572_s13  }
  0x24   : > { %s341_s29 = sand.u32 1, %s1576_s14   ;;  %s1349_s30 = scalar_lea.vmem %s288_s26, 512 }
  0x25   : > { %s2042_s27 = scalar_select %p1714_p2, 1, 0 }
  0x26   : > { %p2019_p7 = pneg %p1714_p2  ;;  %p1350_p8 = scmp.ne.s32.totalorder %s288_s26, %s1349_s30 }
  0x27   : > { %p1357_p12 = scmp.lt.s32.totalorder %s288_s26, %s288_s26  ;;  %p1358_p1 = scmp.lt.s32.totalorder %s1349_s30, %s1349_s30 }
  0x28   : > { %p1352_p9 = pnand %p1350_p8, %p2019_p7 }
  0x29   : > { %p1359_p4 = por %p1358_p1, %p1357_p12 }
  0x2a   : > { %p1353_p10 = pneg %p1352_p9 }
  0x2c   : > { %p1360_p11 = pnand %p1359_p4, %p1353_p10 }
  0x2e   : > { %1363 = shalt.err (!%p1360_p11)
}
  0x2f   : > { %s2013_s10 = smov 128   ;;  %s2017_s15 = smov 8  }
  0x30   : > { %s2043_s3 = sld [smem:[#allocation26_spill]]  ;;  %p1741_p4 = pnand %p1280_p3, %p1685_p5 }
  0x31   : > { %s2015_s30 = sshll.u32 %s1721_s28, 4  ;;  %s2016_s19 = sshll.u32 %s1576_s14, 8 }
  0x32   : > { %s2045_s1 = sld [smem:[#allocation25_spill]]  ;;  %s1758_s17 = scalar_lea.sflag [#allocation7], %s341_s29 }
  0x33   : > { %p1764_p11 = pneg %p1741_p4 }
  0x36   : > { %1257 = dma.hbm_to_vmem [thread:$0]  (!%p1714_p2), %s2043_s3, 512, %s288_s26, [#allocation10], %s2013_s10, %s2013_s10, %s2017_s15  }
  0x37   : > { %s345_s26 = scalar_lea.vmem [#allocation6], %s2015_s30 }
  0x38   : > { %s1752_s23 = scalar_lea.hbm %s2045_s1, %s2016_s19  ;;  %s352_s20 = sshll.u32 %s345_s26, 4  ;;  %s1756_s20 = int_to_ptr.vmem [resolvable:$true] %s352_s20 }
  0x39   : > { %s1364_s18 = scalar_lea.hbm %s1752_s23, 256  ;;  %s1369_s30 = scalar_lea.hbm %s2045_s1, 512 }
  0x3a   : > { %p1365_p5 = scmp.ne.s32.totalorder %s1752_s23, %s1364_s18  ;;  %p1370_p8 = scmp.lt.s32.totalorder %s1752_s23, %s2045_s1 }
  0x3b   : > { %p1371_p9 = scmp.lt.s32.totalorder %s1369_s30, %s1364_s18 }
  0x3c   : > { %p1367_p12 = pnand %p1764_p11, %p1365_p5 }
  0x3d   : > { %p1372_p10 = por %p1371_p9, %p1370_p8 }
  0x3e   : > { %p1368_p3 = pneg %p1367_p12 }
  0x40   : > { %p1373_p1 = pnand %p1372_p10, %p1368_p3 }
  0x42   : > { %1376 = shalt.err (!%p1373_p1)
}
  0x43   : > { %s1377_s29 = scalar_lea.vmem %s1756_s20, 256  ;;  %s1581_s15 = smov [#allocation6]  }
  0x44   : > { %p1378_p0 = scmp.ne.s32.totalorder %s1756_s20, %s1377_s29  ;;  %s1382_s13 = sshll.u32 %s1581_s15, 4  ;;  %s1383_s13 = int_to_ptr.vmem [resolvable:$false] %s1382_s13 }
  0x45   : > { %s1384_s16 = scalar_lea.vmem %s1383_s13, 512  ;;  %p1385_p7 = scmp.lt.s32.totalorder %s1756_s20, %s1383_s13 }
  0x46   : > { %p1380_p5 = pnand %p1378_p0, %p1764_p11  ;;  %p1386_p6 = scmp.lt.s32.totalorder %s1384_s16, %s1377_s29 }
  0x48   : > { %p1381_p12 = pneg %p1380_p5  ;;  %p1387_p13 = por %p1386_p6, %p1385_p7 }
  0x4a   : > { %p1388_p2 = pnand %p1387_p13, %p1381_p12 }
  0x4c   : > { %1391 = shalt.err (!%p1388_p2)
}
  0x4d   : > { %s2047_s19 = smov 8   ;;  %s2048_s30 = smov 128  }
  0x4e   : > { %1267 = dma.hbm_to_vmem [thread:$0]  (!%p1741_p4), %s1752_s23, 256, %s1756_s20, %s1758_s17, %s2048_s30, %s2048_s30, %s2047_s19  }
  0x4f   : > { %s2049_s15 = sshll.u32 %s1576_s14, 8  ;;  %s2050_s13 = sshll.u32 %s1721_s28, 4 }
  0x50   : > { %s1795_s29 = scalar_lea.hbm %s1999_s2, %s2049_s15  ;;  %s366_s16 = scalar_lea.vmem [#allocation8], %s2050_s13 }
  0x51   : > { %s373_s1 = sshll.u32 %s366_s16, 4  ;;  %s1582_s3 = smov [#allocation11]   ;;  %s1799_s1 = int_to_ptr.vmem [resolvable:$true] %s373_s1 }
  0x52   : > { %s300_s11 = sshll.u32 %s1582_s3, 4  ;;  %s1155_s8 = sshll.u32 %s1721_s28, 1  ;;  %s301_s11 = int_to_ptr.vmem [resolvable:$true] %s300_s11 }
  0x53   : > { %s1403_s9 = scalar_lea.vmem %s301_s11, 512  ;;  %p2051_p13 = scmp.ne.s32.totalorder %s2042_s27, 0 }
  0x54   : > { %p1404_p6 = scmp.ne.s32.totalorder %s301_s11, %s1403_s9  ;;  %p1411_p3 = scmp.lt.s32.totalorder %s301_s11, %s301_s11 }
  0x55   : > { %p2052_p2 = pneg %p2051_p13  ;;  %p1412_p8 = scmp.lt.s32.totalorder %s1403_s9, %s1403_s9 }
  0x57   : > { %p1406_p0 = pnand %p1404_p6, %p2052_p2  ;;  %p1413_p9 = por %p1412_p8, %p1411_p3 }
  0x59   : > { %p1407_p7 = pneg %p1406_p0 }
  0x5b   : > { %p1414_p10 = pnand %p1413_p9, %p1407_p7 }
  0x5d   : > { %1417 = shalt.err (!%p1414_p10)
}
  0x5e   : > { %s2053_s4 = sld [smem:[#allocation27_spill]]  ;;  %s1156_s20 = sshll.u32 %s1576_s14, 5 }
  0x5f   : > { %s1817_s9 = scalar_lea.hbm %s1997_s0, %s1156_s20  ;;  %s327_s27 = scalar_lea.vmem [#allocation3], %s1155_s8 }
  0x60   : > { %s334_s26 = sshll.u32 %s327_s27, 4  ;;  %s324_s13 = scalar_lea.sflag [#allocation4], %s1721_s28  ;;  %s335_s26 = int_to_ptr.vmem [resolvable:$true] %s334_s26 }
  0x61   : > { %s1418_s16 = scalar_lea.hbm %s1817_s9, 32  ;;  %s1423_s3 = scalar_lea.hbm %s1997_s0, 64 }
  0x62   : > { %p1419_p1 = scmp.ne.s32.totalorder %s1817_s9, %s1418_s16  ;;  %p1424_p6 = scmp.lt.s32.totalorder %s1817_s9, %s1997_s0 }
  0x64   : > { %1260 = dma.hbm_to_vmem [thread:$0]  (!%p2051_p13), %s2053_s4, 512, %s301_s11, [#allocation10], %s2048_s30, %s2048_s30, %s2047_s19  }
  0x65   : > { %p1421_p5 = pnand %p1419_p1, %p1764_p11  ;;  %p1425_p13 = scmp.lt.s32.totalorder %s1423_s3, %s1418_s16 }
  0x67   : > { %p1422_p12 = pneg %p1421_p5  ;;  %p1426_p2 = por %p1425_p13, %p1424_p6 }
  0x69   : > { %p1427_p0 = pnand %p1426_p2, %p1422_p12 }
  0x6b   : > { %1430 = shalt.err (!%p1427_p0)
}
  0x6c   : > { %s1431_s8 = scalar_lea.vmem %s335_s26, 32  ;;  %s1583_s28 = smov [#allocation3]  }
  0x6d   : > { %p1432_p7 = scmp.ne.s32.totalorder %s335_s26, %s1431_s8  ;;  %s1436_s20 = sshll.u32 %s1583_s28, 4  ;;  %s1437_s20 = int_to_ptr.vmem [resolvable:$false] %s1436_s20 }
  0x6e   : > { %s1438_s18 = scalar_lea.vmem %s1437_s20, 64  ;;  %p1439_p9 = scmp.lt.s32.totalorder %s335_s26, %s1437_s20 }
  0x6f   : > { %p1434_p3 = pnand %p1432_p7, %p1764_p11  ;;  %p1440_p10 = scmp.lt.s32.totalorder %s1438_s18, %s1431_s8 }
  0x71   : > { %p1435_p8 = pneg %p1434_p3  ;;  %p1441_p1 = por %p1440_p10, %p1439_p9 }
  0x73   : > { %p1442_p5 = pnand %p1441_p1, %p1435_p8 }
  0x75   : > { %1445 = shalt.err (!%p1442_p5)
}
  0x76   : > { %1264 = dma.hbm_to_vmem [thread:$0]  (!%p1741_p4), %s1817_s9, 32, %s335_s26, %s324_s13  }
  0x77   : > { %s1446_s4 = scalar_lea.hbm %s1795_s29, 256  ;;  %s1451_s23 = scalar_lea.hbm %s1999_s2, 512 }
  0x78   : > { %p1447_p12 = scmp.ne.s32.totalorder %s1795_s29, %s1446_s4  ;;  %p1452_p2 = scmp.lt.s32.totalorder %s1795_s29, %s1999_s2 }
  0x79   : > { %p1453_p0 = scmp.lt.s32.totalorder %s1451_s23, %s1446_s4 }
  0x7a   : > { %p1449_p6 = pnand %p1447_p12, %p1764_p11 }
  0x7b   : > { %p1454_p7 = por %p1453_p0, %p1452_p2 }
  0x7c   : > { %p1450_p13 = pneg %p1449_p6 }
  0x7e   : > { %p1455_p3 = pnand %p1454_p7, %p1450_p13 }
  0x80   : > { %1458 = shalt.err (!%p1455_p3)
}
  0x81   : > { %s1459_s9 = scalar_lea.vmem %s1799_s1, 256  ;;  %s1584_s26 = smov [#allocation8]  }
  0x82   : > { %p1460_p8 = scmp.ne.s32.totalorder %s1799_s1, %s1459_s9  ;;  %s1464_s13 = sshll.u32 %s1584_s26, 4  ;;  %s1465_s13 = int_to_ptr.vmem [resolvable:$false] %s1464_s13 }
  0x83   : > { %s1466_s15 = scalar_lea.vmem %s1465_s13, 512  ;;  %p1467_p1 = scmp.lt.s32.totalorder %s1799_s1, %s1465_s13 }
  0x84   : > { %p1462_p9 = pnand %p1460_p8, %p1764_p11  ;;  %p1468_p5 = scmp.lt.s32.totalorder %s1466_s15, %s1459_s9 }
  0x86   : > { %p1463_p10 = pneg %p1462_p9  ;;  %p1469_p12 = por %p1468_p5, %p1467_p1 }
  0x88   : > { %p1470_p6 = pnand %p1469_p12, %p1463_p10 }
  0x8a   : > { %1473 = shalt.err (!%p1470_p6)
}
  0x8b   : > { %1270 = dma.hbm_to_vmem [thread:$0]  (!%p1741_p4), %s1795_s29, 256, %s1799_s1, %s1758_s17, %s2048_s30, %s2048_s30, %s2047_s19  }
  0x8c   : > { %p2054_p11 = scmp.ne.s32.totalorder %s2041_s24, 0 }
  0x8d   : > { %s1863_s10 = sand.u32 (!%p2054_p11), 1, %s1568_s12   ;;  %p2055_p13 = scmp.ne.s32.totalorder (!%p2054_p11), %s2037_s21, 0 }
  0x8e   : > { %385 = sbr.rel (%p2054_p11) target bundleno = 1318 (0x526), region = 52  ;;  %s1866_s8 = sshll.u32 (!%p2054_p11), %s1863_s10, 1 }
  0x8f   : > { %s388_s25 = scalar_lea.sflag (!%p2054_p11), [#allocation4], %s1863_s10  ;;  %s391_s28 = scalar_lea.vmem (!%p2054_p11), [#allocation3], %s1866_s8 }
  0x93   : > { %1543 = dma.done.wait (%p2055_p13), %s388_s25, 32  }
  0x94   : > { %1545 = vsyncadd (%p2055_p13), %s388_s25, 4294967264  ;;  %s396_s1 = sand.u32 1, %s1667_s7   ;;  %s1165_s24 = sshll.u32 %s1863_s10, 4 }
  0x95   : > { %s397_s17 = scalar_lea.sflag [#allocation7], %s396_s1  ;;  %s1876_s19 = scalar_lea.vmem [#allocation6], %s1165_s24 }
  0x96   : > { %1547 = dma.done.wait (%p2055_p13), %s397_s17, 512  }
  0x97   : > { %1549 = vsyncadd (%p2055_p13), %s397_s17, 4294966784  ;;  %s1882_s30 = scalar_lea.vmem [#allocation8], %s1165_s24  ;;  %p2056_p4 = scmp.eq.s32.totalorder %s1667_s7, 0 }
  0x99   : > { %1551 = dma.done.wait (%p2056_p4), [#allocation10], 1024   ;;  %p2057_p2 = pmov %p2056_p4 }
  0x9a   : > { %v1585_v1 = vmov 0.0   ;;  %vm1586_vm0 = vmmov 0   ;;  %v477_v2 = vld [vmem:[#allocation9 + $0x18] sm:$0xff]  ;;  %v476_v4 = vld [vmem:[#allocation9 + $0x10] sm:$0xff]  ;;  %v475_v6 = vld [vmem:[#allocation9 + $0x8] sm:$0xff]  ;;  %vm485_vm1 = vcmask 261120   ;;  %v644_v17 = vlaneseq }
  0x9b   : > { %1553 = vsyncadd (%p2057_p2), [#allocation10], 4294966272  ;;  %1215 = vmatprep.subr.mxu1 %v1585_v1  ;;  %1223 = vmatprep.mubr.msk.f32.mxu1 %vm1586_vm0, %v1585_v1  ;;  %v481_v3 = vld [vmem:[#allocation11 + $0x18] sm:$0xff]  ;;  %v480_v5 = vld [vmem:[#allocation11 + $0x10] sm:$0xff]  ;;  %v1587_v14 = vmov 0   ;;  %vm722_vm2 = vcmask 1041409  }
  0x9c   : > { %1216 = vmatpush3.msra.mxu1 %v477_v2  ;;  %1204 = vmatprep.subr.mxu0 %v481_v3  ;;  %v479_v7 = vld [vmem:[#allocation11 + $0x8] sm:$0xff]  ;;  %v474_v8 = vld [vmem:[#allocation9] sm:$0xff]  ;;  %v469_v10 = vld [vmem:[%s391_s28] sm:$0x3]  ;;  %v1588_v15 = vmov 1966171168  }
  0x9d   : > { %1217 = vmatprep.subr.mxu1 %v1585_v1  ;;  %1205 = vmatpush3.msra.mxu0 %v481_v3  ;;  %v478_v9 = vld [vmem:[#allocation11] sm:$0xff]  ;;  %v471_v12 = vld [vmem:[%s1876_s19 + $0x8] sm:$0xff]  ;;  %v642_v16 = vunpack.c.l.s4 %v1588_v15  ;;  %v1898_v19 = vshrl.u32 %v644_v17, 7  ;;  %v713_v44 = vand.u32 127, %v644_v17  ;;  %vm725_vm3 = vcmask 58368   ;;  %s466_s4 = scalar_lea.vmem [#allocation13], %s1866_s8 }
  0x9e   : > { %1218 = vmatpush3.msra.mxu1 %v476_v4  ;;  %1206 = vmatprep.subr.mxu0 %v480_v5  ;;  %v470_v11 = vld [vmem:[%s1876_s19] sm:$0xff]  ;;  %v1176_v13 = vld [vmem:[#allocation2] ss:$0 sm:$0xff]  ;;  %vm792_vm4 = vcmask 64512   ;;  %s1188_s27 = sshll.u32 %s1667_s7, 5  ;;  %s986_s16 = sshll.u32 %s466_s4, 4  ;;  %s987_s16 = int_to_ptr.vmem [resolvable:$true] %s986_s16 }
  0x9f   : > { %1219 = vmatprep.subr.mxu1 %v1585_v1  ;;  %1207 = vmatpush3.msra.mxu0 %v480_v5  ;;  %v643_v18 = vunpack.c.0.s8 %v642_v16  ;;  %v1902_v23 = vsub.s32 0, %v1898_v19  ;;  %v1174_v30 = vld [vmem:[%s2002_s5] ss:$0 sm:$0xff]  ;;  %v716_v47 = vsub.s32 %v713_v44, %v1898_v19  ;;  %v736_v55 = vsub.s32 1, %v1898_v19  ;;  %s2058_s3 = sld [smem:[#allocation29_spill]]  ;;  %s957_s26 = scalar_lea.sflag [#allocation14], %s1863_s10 }
  0xa0   : > { %1220 = vmatpush3.msra.mxu1 %v475_v6  ;;  %1208 = vmatprep.subr.mxu0 %v479_v7  ;;  %v1175_v37 = vld [vmem:[%s2003_s6] ss:$0 sm:$0xff]  ;;  %s1474_s13 = scalar_lea.vmem %s987_s16, 32  ;;  %p2059_p7 = scmp.ne.s32.totalorder %s2038_s22, 0 }
  0xa1   : > { %1221 = vmatprep.subr.mxu1 %v1585_v1  ;;  %1209 = vmatpush3.msra.mxu0 %v479_v7  ;;  %v646_v20 = vsub.s32 %v643_v18, %v1898_v19  ;;  %v473_v16 = vld [vmem:[%s1882_s30 + $0x8] sm:$0xff]  ;;  %p1475_p0 = scmp.ne.s32.totalorder %s987_s16, %s1474_s13  ;;  %s1589_s15 = smov [#allocation13]  }
  0xa2   : > { %1222 = vmatpush3.msra.mxu1 %v474_v8  ;;  %1210 = vmatprep.subr.mxu0 %v478_v9  ;;  %s1478_s25 = sshll.u32 %s1589_s15, 4  ;;  %s1479_s25 = int_to_ptr.vmem [resolvable:$false] %s1478_s25 }
  0xa3   : > { %1224 = vmatmul.mubr.msk.f32.vlgmr.msra.gmra.mxu1 %vm485_vm1, %v469_v10  ;;  %1211 = vmatpush3.msra.mxu0 %v478_v9  ;;  %p1476_p3 = pnand %p1475_p0, %p2059_p7  ;;  %s1480_s28 = scalar_lea.vmem %s1479_s25, 64 }
  0xa4   : > { %1212 = vmatprep.mubr.msk.f32.mxu0 %vm485_vm1, %v470_v11  ;;  %1226 = vmatprep.subr.mxu0 %v1585_v1  ;;  %p1481_p9 = scmp.lt.s32.totalorder %s987_s16, %s1479_s25  ;;  %p1482_p10 = scmp.lt.s32.totalorder %s1480_s28, %s1474_s13 }
  0xa5   : > { %1213 = vmatmul.mubr.msk.f32.vlgmr.msra.gmra.mxu0 %vm485_vm1, %v471_v12  ;;  %1231 = vmatprep.subr.mxu1 %v1585_v1  ;;  %s984_s9 = scalar_lea.hbm %s2058_s3, %s1188_s27  ;;  %p1477_p8 = pneg %p1476_p3 }
  0xa6   : > { %1228 = vmatprep.mubr.msk.f32.mxu0 %vm1586_vm0, %v1585_v1  ;;  %1233 = vmatprep.mubr.msk.f32.mxu1 %vm1586_vm0, %v1585_v1  ;;  %p1483_p1 = por %p1482_p10, %p1481_p9 }
  0xa7   : > { %1326 = vset.pattern.permute.xlu1 %v1587_v14  ;;  %1327 = vset.pattern.permute.xlu0 %v1587_v14 }
  0xa8   : > { %705 = vperm.xlu1 %1326, %v1176_v13   ;;  %v472_v13 = vld [vmem:[%s1882_s30] sm:$0xff]  ;;  %1232 = vmatpush3.msra.mxu1 %v473_v16  ;;  %p1484_p5 = pnand %p1483_p1, %p1477_p8 }
  0xa9   : > { %1227 = vmatpush3.msra.mxu0 %v472_v13 }
 0x123   : > { %v706_v45 = vpop.permute.xlu1 %705 }
 0x163   : > { %v636_v21 = vpop.f32.mrf.mxu1 }
 0x164   : > { %v647_v22 = vrot.slane %v636_v21, %v646_v20 }
 0x165   : > { %v1214_v24 = vpop.f32.mrf.mxu0  ;;  %v1225_v25 = vpop.f32.mrf.mxu1 }
 0x166   : > { %v648_v26 = vcombine.high %v647_v22, %v647_v22  ;;  %v655_v27 = vrot.slane %v647_v22, %v646_v20 }
 0x167   : > { %v558_v31 = vpop.f32.mrf.mxu0 }
 0x168   : > { %v662_v28 = vrot.slane %v648_v26, %v646_v20  ;;  %v666_v29 = vrot.slane %v655_v27, %v1902_v23 }
 0x16a   : > { %v670_v32 = vrot.slane %v662_v28, %v1902_v23  ;;  %v673_v33 = vadd.f32 %v666_v29, %v558_v31 }
 0x16c   : > { %v674_v34 = vadd.f32 %v1214_v24, %v670_v32  ;;  %v681_v35 = vadd.f32 %v1174_v30, %v673_v33 }
 0x16e   : > { %v682_v36 = vadd.f32 %v1174_v30, %v674_v34  ;;  %1328 = vtanh.f32 %v681_v35 }
 0x170   : > { %1330 = vtanh.f32 %v682_v36 }
 0x17b   : > { %v1329_v38 = vpop.eup %1328 }
 0x17c   : > { %v691_v39 = vmul.f32 %v1329_v38, %v1175_v37 }
 0x17d   : > { %v1331_v40 = vpop.eup %1330 }
 0x17e   : > { %v693_v41 = vsel %vm485_vm1, %v691_v39, 0.0  ;;  %v692_v42 = vmul.f32 %v1331_v40, %v1175_v37 }
 0x17f   : > { %694 = vadd.xlane.f32.xlu0 %v693_v41 }
 0x180   : > { %v696_v43 = vsel %vm485_vm1, %v692_v42, 0.0 }
 0x183   : > { %697 = vadd.xlane.f32.xlu0 %v696_v43 }
 0x208   : > { %v695_v46 = vpop.xlane.xlu0 %694 }
 0x209   : > { %v708_v48 = vadd.f32 %v706_v45, %v695_v46 }
 0x20b   : > { %v717_v51 = vrot.slane %v708_v48, %v716_v47 }
 0x20c   : > { %v698_v49 = vpop.xlane.xlu0 %697 }
 0x20d   : > { %v709_v50 = vadd.f32 %v706_v45, %v698_v49 }
 0x20f   : > { %v721_v52 = vrot.slane %v709_v50, %v716_v47 }
 0x211   : > { %v723_v53 = vsel %vm722_vm2, %v721_v52, %v717_v51 }
 0x212   : > { %v726_v54 = vsel %vm725_vm3, %v723_v53, -inf }
 0x213   : > { %727 = vmax.xlane.f32.xlu1 %v726_v54 }
 0x29c   : > { %v728_v56 = vpop.xlane.xlu1 %727 }
 0x29d   : > { %v733_v57 = vrot.slane %v728_v56, %v1902_v23  ;;  %v737_v58 = vrot.slane %v728_v56, %v736_v55 }
 0x29f   : > { %v740_v59 = vsub.f32 %v708_v48, %v733_v57  ;;  %v741_v60 = vsub.f32 %v709_v50, %v737_v58 }
 0x2a1   : > { %v742_v61 = vmul.f32 1.442695, %v740_v59  ;;  %v744_v62 = vmul.f32 1.442695, %v741_v60 }
 0x2a3   : > { %1332 = vpow2.f32 %v742_v61 }
 0x2a4   : > { %1334 = vpow2.f32 %v744_v62 }
 0x2b0   : > { %v1333_v63 = vpop.eup %1332 }
 0x2b1   : > { %v1335_v0 = vpop.eup %1334  ;;  %749 = vperm.xlu0 %1327, %v1333_v63  }
 0x2b2   : > { %752 = vperm.xlu1 %1326, %v1335_v0  }
 0x32c   : > { %v750_v1 = vpop.permute.xlu0 %749 }
 0x32d   : > { %v753_v2 = vpop.permute.xlu1 %752  ;;  %v757_v3 = vrot.slane %v750_v1, %v716_v47 }
 0x32e   : > { %v761_v4 = vrot.slane %v753_v2, %v716_v47 }
 0x330   : > { %v762_v5 = vsel %vm722_vm2, %v761_v4, %v757_v3 }
 0x331   : > { %v764_v6 = vsel %vm725_vm3, %v762_v5, 0.0 }
 0x332   : > { %765 = vadd.xlane.f32.xlu0 %v764_v6 }
 0x3bb   : > { %v766_v7 = vpop.xlane.xlu0 %765 }
 0x3bc   : > { %1336 = vrcp.f32 %v766_v7 }
 0x3c9   : > { %v1337_v8 = vpop.eup %1336 }
 0x3ca   : > { %v768_v9 = vmul.f32 %v1337_v8, %v766_v7 }
 0x3cc   : > { %v769_v10 = vsub.f32 2.0, %v768_v9 }
 0x3ce   : > { %v770_v11 = vmul.f32 %v1337_v8, %v769_v10 }
 0x3d0   : > { %v775_v12 = vrot.slane %v770_v11, %v1902_v23  ;;  %v779_v14 = vrot.slane %v770_v11, %v736_v55 }
 0x3d2   : > { %v782_v15 = vmul.f32 %v1333_v63, %v775_v12  ;;  %v783_v17 = vmul.f32 %v1335_v0, %v779_v14 }
 0x3d4   : > { %786 = vperm.xlu1 %1326, %v782_v15  }
 0x3d8   : > { %867 = vperm.xlu1 %1326, %v783_v17  }
 0x44f   : > { %v787_v18 = vpop.permute.xlu1 %786 }
 0x450   : > { %v791_v19 = vrot.slane %v787_v18, %v716_v47 }
 0x452   : > { %1229 = vmatmul.mubr.msk.f32.vlgmr.msra.gmra.mxu0 %vm792_vm4, %v791_v19 }
 0x453   : > { %v868_v20 = vpop.permute.xlu1 %867 }
 0x454   : > { %v872_v21 = vrot.slane %v868_v20, %v716_v47 }
 0x456   : > { %v948_v22 = vsel %vm722_vm2, %v872_v21, %v791_v19  ;;  %1234 = vmatmul.mubr.msk.f32.vlgmr.msra.gmra.mxu1 %vm792_vm4, %v872_v21 }
 0x457   : > { %950 = vst.msk [vmem:[%s466_s4] sm:$0x3] %vm725_vm3, %v948_v22 }
 0x458   : > { %1487 = shalt.err (!%p1484_p5)
}
 0x459   : > { %s1488_s1 = scalar_lea.hbm %s984_s9, 32  ;;  %s1492_s19 = scalar_lea.hbm %s2058_s3, 64 }
 0x45a   : > { %p1489_p12 = scmp.ne.s32.totalorder %s984_s9, %s1488_s1  ;;  %p1493_p13 = scmp.lt.s32.totalorder %s984_s9, %s2058_s3 }
 0x45b   : > { %p1494_p4 = scmp.lt.s32.totalorder %s1492_s19, %s1488_s1 }
 0x45c   : > { %p1490_p6 = pnand %p1489_p12, %p2059_p7 }
 0x45d   : > { %p1495_p2 = por %p1494_p4, %p1493_p13 }
 0x45e   : > { %p1491_p11 = pneg %p1490_p6 }
 0x460   : > { %p1496_p0 = pnand %p1495_p2, %p1491_p11 }
 0x462   : > { %1499 = shalt.err (!%p1496_p0)
}
 0x463   : > { %1251 = dma.vmem_to_hbm [thread:$0]  (%p2059_p7), %s987_s16, 32, %s984_s9, %s957_s26   ;;  %vm945_vm5 = vcmask 253952  }
 0x464   : > { %s459_s29 = scalar_lea.vmem [#allocation12], %s1866_s8  ;;  %s2060_s23 = sld [smem:[#allocation28_spill]] }
 0x465   : > { %s970_s20 = sshll.u32 %s459_s29, 4  ;;  %s952_s16 = scalar_lea.sflag [#allocation5], %s1863_s10  ;;  %s1947_s20 = int_to_ptr.vmem [resolvable:$true] %s970_s20 }
 0x466   : > { %s1500_s8 = scalar_lea.vmem %s1947_s20, 32  ;;  %s1590_s9 = smov [#allocation12]  }
 0x467   : > { %p1501_p3 = scmp.ne.s32.totalorder %s1947_s20, %s1500_s8  ;;  %s1504_s26 = sshll.u32 %s1590_s9, 4  ;;  %s1505_s26 = int_to_ptr.vmem [resolvable:$false] %s1504_s26 }
 0x468   : > { %s1506_s13 = scalar_lea.vmem %s1505_s26, 64  ;;  %p1507_p10 = scmp.lt.s32.totalorder %s1947_s20, %s1505_s26 }
 0x469   : > { %p1502_p8 = pnand %p1501_p3, %p2059_p7  ;;  %p1508_p1 = scmp.lt.s32.totalorder %s1506_s13, %s1500_s8 }
 0x46a   : > { %s1954_s11 = scalar_lea.hbm %s2060_s23, %s1188_s27 }
 0x46b   : > { %p1503_p9 = pneg %p1502_p8  ;;  %p1509_p5 = por %p1508_p1, %p1507_p10 }
 0x46d   : > { %p1510_p12 = pnand %p1509_p5, %p1503_p9 }
 0x512   : > { %v861_v23 = vpop.f32.mrf.mxu0 }
 0x513   : > { %946 = vst.msk [vmem:[%s459_s29] sm:$0x1] %vm945_vm5, %v861_v23 }
 0x514   : > { %v1230_v24 = vpop.f32.mrf.mxu0 }
 0x516   : > { %v941_v25 = vpop.f32.mrf.mxu1 }
 0x517   : > { %947 = vst.msk [vmem:[%s459_s29 + $0x1] sm:$0x1] %vm945_vm5, %v941_v25 }
 0x518   : > { %v1235_v26 = vpop.f32.mrf.mxu1 }
 0x519   : > { %1513 = shalt.err (!%p1510_p12)
}
 0x51a   : > { %s1514_s7 = scalar_lea.hbm %s1954_s11, 32  ;;  %s1518_s25 = scalar_lea.hbm %s2060_s23, 64 }
 0x51b   : > { %p1515_p6 = scmp.ne.s32.totalorder %s1954_s11, %s1514_s7  ;;  %p1519_p4 = scmp.lt.s32.totalorder %s1954_s11, %s2060_s23 }
 0x51c   : > { %p1520_p2 = scmp.lt.s32.totalorder %s1518_s25, %s1514_s7 }
 0x51d   : > { %p1516_p11 = pnand %p1515_p6, %p2059_p7 }
 0x51e   : > { %p1521_p0 = por %p1520_p2, %p1519_p4 }
 0x51f   : > { %p1517_p13 = pneg %p1516_p11 }
 0x521   : > { %p1522_p3 = pnand %p1521_p0, %p1517_p13 }
 0x523   : > { %1525 = shalt.err (!%p1522_p3)
}
 0x524   : > { %s1591_s24 = smov 16   ;;  %s1592_s17 = smov 1  }
 0x525   : > { %1250 = dma.vmem_to_hbm [thread:$0]  (%p2059_p7), %s1947_s20, 32, %s1954_s11, %s952_s16, %s1591_s24, %s1591_s24, %s1592_s17  }
 0x526 PF: > { %s2061_s19 = sld [smem:[#allocation20_spill]]  ;;  %p2064_p9 = scmp.ge.s32.totalorder %s1576_s14, 2 }
 0x527   : > { %s2062_s30 = sld [smem:[#allocation24_spill]] }
 0x52c   : > { %s998_s21 = sand.u32 1, %s2061_s19  }
 0x52d   : > { %p2063_p8 = scmp.ne.s32.totalorder %s2062_s30, 0  ;;  %s999_s29 = scalar_lea.sflag [#allocation5], %s998_s21 }
 0x52f   : > { %p1272_p10 = pnand %p2064_p9, %p2063_p8 }
 0x531   : > { %p1273_p1 = pneg %p1272_p10 }
 0x533   : > { %1555 = dma.done.wait (%p1273_p1), %s999_s29, 32  }
 0x534   : > { %1557 = vsyncadd (%p1273_p1), %s999_s29, 4294967264  ;;  %s1008_s18 = scalar_lea.sflag [#allocation14], %s998_s21 }
 0x535   : > { %1559 = dma.done.wait (%p1273_p1), %s1008_s18, 32  }
 0x536   : > { %1561 = vsyncadd (%p1273_p1), %s1008_s18, 4294967264  ;;  %s2065_s14 = sld [smem:[#allocation22_spill]]  ;;  %s2068_s11 = smov %s1568_s12 }
 0x537   : > { %s2066_s22 = sld [smem:[#allocation21_spill]] }
 0x538   : > { %s2067_s13 = sld [smem:[#allocation23_spill]] }
 0x53c   : > { %p32_p7 = scmp.ge.s32.totalorder %s2065_s14, 4  }
 0x53d   : > { %s2069_s12 = smov %s2066_s22 }
 0x53e   :  { %34 = sbr.rel (!%p32_p7) target bundleno = 16 (0x10), region = 146 }
 0x543   :  { %1013 = vsyncpa [#allocation4], 1 }
 0x544   :  { %1015 = vsyncpa [#allocation4 + $0x1], 1 }
 0x545   :  { %1016 = vsyncpa [#allocation7], 1 }
 0x546   :  { %1018 = vsyncpa [#allocation7 + $0x1], 1 }
 0x547   :  { %1019 = vsyncpa [#allocation10], 1 }
 0x548   :  { %1020 = vsyncpa [#allocation5], 1 }
 0x549   :  { %1022 = vsyncpa [#allocation5 + $0x1], 1 }
 0x54a   :  { %1023 = vsyncpa [#allocation14], 1 }
 0x54b   :  { %1025 = vsyncpa [#allocation14 + $0x1], 1 }

</bundles_post_ra>
